<compile_context>
chip_gen: v5e
topology: v5e:2x2
jax: 0.10.0
libtpu: 0.0.40
codegen_flags: <defaults>
</compile_context>

<pallas_src>
import functools

import jax
import jax.numpy as jnp
from jax import lax
from jax.experimental import pallas as pl
from jax.experimental.pallas import tpu as pltpu

BN_EPS = 1e-5

# Contract lhs dim 1 with rhs dim 1 (A @ B.T) -- the NT dimension-number
# pattern used by the official flash-attention TPU kernel for q @ k.T.
_NT_DIMS = (((1,), (1,)), ((), ()))

# Per-layer output channels of Corr_net: (hidden+3) -> 32 -> 16 -> 8 -> 3.
_CH = (32, 16, 8, 3)


def _round_up(x, m):
    return (x + m - 1) // m * m


def _cdiv(a, b):
    return (a + b - 1) // b


def default_pack_factor():
    """Rows packed per MXU pass via block-diagonal weights.

    g=7 fills a 256-wide MXU (v6e/v7x: 7*35=245, 7*32=224 <= 256);
    g=3 fills a 128-wide MXU (v5e and older: 3*35=105, 3*32=96 <= 128).
    Any g is functionally correct; it only changes MXU utilization.
    """
    try:
        kind = jax.devices()[0].device_kind.lower()
    except Exception:
        return 7
    return 7 if ("v6" in kind or "v7" in kind) else 3


def _corr_net_kernel(
    x_ref,
    w1_ref, b1_ref,
    w2_ref, b2_ref,
    w3_ref, b3_ref,
    w4_ref, b4_ref,
    o_ref,
    *,
    activation: bool,
):
    # Input tile: (TILE_P, g*C_in); bf16 on the padded path (no-op cast) or
    # f32 on the zero-copy path (cheap VPU cast, hidden under the DMA).
    x = x_ref[...].astype(jnp.bfloat16)

    # Layer 1 in transposed orientation: (g*32, TILE_P) = W1' @ x.T
    h = lax.dot_general(w1_ref[...], x, _NT_DIMS,
                        preferred_element_type=jnp.float32)
    h = jnp.maximum(h + b1_ref[...], 0.0).astype(jnp.bfloat16)

    def layer(h, w_ref, b_ref):
        # (g*C_out, g*C_in) @ (g*C_in, TILE_P), f32 accumulation on the MXU.
        y = jnp.dot(w_ref[...], h, preferred_element_type=jnp.float32)
        return y + b_ref[...]

    h = jnp.maximum(layer(h, w2_ref, b2_ref), 0.0).astype(jnp.bfloat16)
    h = jnp.maximum(layer(h, w3_ref, b3_ref), 0.0).astype(jnp.bfloat16)

    h = layer(h, w4_ref, b4_ref)            # (g*3, TILE_P) f32
    if activation:
        h = jnp.tanh(h)

    # Lane-dense store: minor dim is the packed-row tile (multiple of 128).
    o_ref[...] = h.astype(o_ref.dtype)


def fold_corr_net_params(params, *, g=None):
    """One-time parameter prep (hoisted out of the hot path).

    1) Folds BatchNorm (inference stats) into the conv weights/bias:
         scale = gamma * rsqrt(var + eps)
         W'    = W * scale[:, None]
         b'    = (b - mean) * scale + beta
    2) Expands each layer to block-diagonal form so g independent rows are
       processed per MXU pass:  Wg = kron(I_g, W')  (g*C_out, g*C_in),
       bg = tile(b', g) as a (g*C_out, 1) f32 column.
    Weights are cast to bf16 for the MXU; biases stay f32.
    """
    if g is None:
        g = default_pack_factor()
    eye = jnp.eye(g, dtype=jnp.float32)
    folded = []
    for i in (1, 2, 3, 4):
        w = params[f"conv{i}"]["w"].astype(jnp.float32)    # (C_out, C_in)
        b = params[f"conv{i}"]["b"].astype(jnp.float32)    # (C_out,)
        if i < 4:                                          # BN after conv1..3
            bn = params[f"bn{i}"]
            scale = bn["gamma"] * jax.lax.rsqrt(bn["var"] + BN_EPS)
            w = w * scale[:, None]
            b = (b - bn["mean"]) * scale + bn["beta"]
        wg = jnp.kron(eye, w)                              # block-diagonal
        bg = jnp.tile(b, g).reshape(-1, 1)
        folded += [wg.astype(jnp.bfloat16), bg.astype(jnp.float32)]
    return folded


@functools.partial(jax.jit, static_argnames=("activation", "tile_p"))
def corr_net_forward(code, folded_params, *, activation=True, tile_p=1024):
    """code: (B, N, hidden+3) float32 -> (B, N, 3) float32."""
    B, N, C_in = code.shape
    rows = B * N

    w1 = folded_params[0]
    if w1.shape[1] % C_in != 0:
        raise ValueError("folded params do not match the input channel count")
    g = w1.shape[1] // C_in            # row-packing factor baked into weights
    gC = g * C_in
    g3 = folded_params[6].shape[0]     # = g * 3 packed output channels

    # ---- tiling -------------------------------------------------------------
    packed_rows = _cdiv(rows, g)
    # Packed-row tile: multiple of 128 (lane-dense, unmasked output stores),
    # capped at tile_p, and never bigger than ~half the problem so that larger
    # workloads always produce >=2 grid steps (both v7x TensorCores get work
    # under the "parallel" axis).
    tile_cap = max(128, _round_up(tile_p, 128))
    tile = min(tile_cap, max(128, _round_up(_cdiv(packed_rows, 2), 128)))
    packed_rows_pad = _round_up(packed_rows, tile)
    rows_pad = packed_rows_pad * g
    grid = (packed_rows_pad // tile,)

    # ---- input prep ---------------------------------------------------------
    x = code.reshape(rows, C_in)
    if rows_pad != rows:
        # Single fused pad+cast pass (no standalone cast, no extra f32 pad
        # pass); the kernel then reads bf16 -> half the HBM read bytes.
        x = jnp.pad(x.astype(jnp.bfloat16), ((0, rows_pad - rows), (0, 0)))
    # Row-major (rows_pad, C_in) -> (rows_pad/g, g*C_in) is a free view.
    x = x.reshape(packed_rows_pad, gC)

    # ---- advisory cost hint for XLA's scheduler -----------------------------
    flops = 2 * rows * sum(ci * co for ci, co in zip((C_in,) + _CH[:-1], _CH))
    param_bytes = sum(int(p.size) * p.dtype.itemsize for p in folded_params)
    cost = pl.CostEstimate(
        flops=flops,
        transcendentals=(3 * rows) if activation else 0,
        bytes_accessed=rows * (C_in * x.dtype.itemsize + 3 * 4) + param_bytes,
    )

    def full_spec(arr):
        # Constant across the grid: fixed block index -> loaded once, Pallas
        # skips re-DMA on later steps.  Total params < 200 KB.
        return pl.BlockSpec(arr.shape, lambda i: (0, 0))

    in_specs = [pl.BlockSpec((tile, gC), lambda i: (i, 0))]
    in_specs += [full_spec(a) for a in folded_params]

    out_t = pl.pallas_call(
        functools.partial(_corr_net_kernel, activation=activation),
        out_shape=jax.ShapeDtypeStruct((g3, packed_rows_pad), jnp.float32),
        grid_spec=pltpu.PrefetchScalarGridSpec(
            num_scalar_prefetch=0,
            grid=grid,
            in_specs=in_specs,
            out_specs=pl.BlockSpec((g3, tile), lambda i: (0, i)),
        ),
        compiler_params=pltpu.CompilerParams(
            dimension_semantics=("parallel",),
            vmem_limit_bytes=32 * 1024 * 1024,
        ),
        cost_estimate=cost,
    )(x, *folded_params)

    # (g*3, P) -> (B, N, 3): ungroup the packed rows, strip padding (tiny
    # epilogue, ~24 B/row).
    # TODO(synk): expose the channels-major (3, rows) layout directly if the
    # downstream consumer can take it; that removes this transpose entirely.
    out = out_t.reshape(g, 3, packed_rows_pad).transpose(2, 0, 1)
    out = out.reshape(rows_pad, 3)[:rows]
    return out.reshape(B, N, 3)


def init_params(hidden_size, key):
    """Deterministic synthetic parameters matching Corr_net.__init__ shapes."""
    c_in = hidden_size + 3
    dims = [(c_in, 32), (32, 16), (16, 8), (8, 3)]
    params = {}
    keys = jax.random.split(key, 16)
    k_it = iter(keys)
    for idx, (ci, co) in enumerate(dims, start=1):
        w = jax.random.normal(next(k_it), (co, ci), jnp.float32) * 0.1  # (C_out, C_in)
        b = jax.random.normal(next(k_it), (co,), jnp.float32) * 0.05
        params[f"conv{idx}"] = {"w": w, "b": b}
        if idx <= 3:  # BN after the first three convs only
            params[f"bn{idx}"] = {
                "gamma": 1.0 + 0.1 * jax.random.normal(next(k_it), (co,), jnp.float32),
                "beta": 0.05 * jax.random.normal(next(k_it), (co,), jnp.float32),
                "mean": jnp.zeros((co,), jnp.float32),
                "var": jnp.ones((co,), jnp.float32),
            }
    return params


def corr_net_reference(code, params, *, activation=True):
    """Pure-JAX f32 reference with the original (unfolded, unpacked) math."""
    B, N, C = code.shape
    h = code.reshape(B * N, C).astype(jnp.float32)
    for i in (1, 2, 3):
        p, bn = params[f"conv{i}"], params[f"bn{i}"]
        h = h @ p["w"].T + p["b"]
        h = (h - bn["mean"]) / jnp.sqrt(bn["var"] + BN_EPS) * bn["gamma"] + bn["beta"]
        h = jnp.maximum(h, 0.0)
    p4 = params["conv4"]
    h = h @ p4["w"].T + p4["b"]
    if activation:
        h = jnp.tanh(h)
    return h.reshape(B, N, 3)


if __name__ == "__main__":
    hidden_size = 32          # -> C_in = 35
    B, N = 2, 200             # rows = 400 (exercises the fused pad+cast path)

    key = jax.random.PRNGKey(0)
    k_code, k_params = jax.random.split(key)
    code = jax.random.normal(k_code, (B, N, hidden_size + 3), jnp.float32)
    params = init_params(hidden_size, k_params)

    folded = fold_corr_net_params(params)   # one-time prep: BN fold + g-packing

    out = corr_net_forward(code, folded, activation=True)
    out = jax.block_until_ready(out)

    ref = corr_net_reference(code, params, activation=True)
    assert out.shape == (B, N, 3)
    max_err = float(jnp.max(jnp.abs(out - ref)))
    # bf16 matmul operands (f32 accumulation) vs f32 reference -> relaxed tol.
    assert max_err < 2e-2, f"mismatch vs reference: max abs err {max_err}"

    print("KERNEL_OK")
</pallas_src>

<mosaic_0001>
module attributes {stable_mosaic.version = 11 : i64} {
  func.func @_corr_net_kernel(%arg0: i32, %arg1: memref<128x105xbf16, #tpu.memory_space<vmem>>, %arg2: memref<96x105xbf16, #tpu.memory_space<vmem>>, %arg3: memref<96x1xf32, #tpu.memory_space<vmem>>, %arg4: memref<48x96xbf16, #tpu.memory_space<vmem>>, %arg5: memref<48x1xf32, #tpu.memory_space<vmem>>, %arg6: memref<24x48xbf16, #tpu.memory_space<vmem>>, %arg7: memref<24x1xf32, #tpu.memory_space<vmem>>, %arg8: memref<9x24xbf16, #tpu.memory_space<vmem>>, %arg9: memref<9x1xf32, #tpu.memory_space<vmem>>, %arg10: memref<9x128xf32, #tpu.memory_space<vmem>>) attributes {dimension_semantics = [#tpu.dimension_semantics<parallel>], iteration_bounds = array<i64: 2>, scalar_prefetch = 0 : i64, scratch_operands = 0 : i64, tpu.core_type = #tpu.core_type<tc>, window_params = [{transform_indices = @transform_0, window_bounds = array<i64: 128, 105>}, {pipeline_mode = #tpu.pipeline_mode<synchronous>, transform_indices = @transform_1, window_bounds = array<i64: 96, 105>}, {pipeline_mode = #tpu.pipeline_mode<synchronous>, transform_indices = @transform_2, window_bounds = array<i64: 96, 1>}, {pipeline_mode = #tpu.pipeline_mode<synchronous>, transform_indices = @transform_3, window_bounds = array<i64: 48, 96>}, {pipeline_mode = #tpu.pipeline_mode<synchronous>, transform_indices = @transform_4, window_bounds = array<i64: 48, 1>}, {pipeline_mode = #tpu.pipeline_mode<synchronous>, transform_indices = @transform_5, window_bounds = array<i64: 24, 48>}, {pipeline_mode = #tpu.pipeline_mode<synchronous>, transform_indices = @transform_6, window_bounds = array<i64: 24, 1>}, {pipeline_mode = #tpu.pipeline_mode<synchronous>, transform_indices = @transform_7, window_bounds = array<i64: 9, 24>}, {pipeline_mode = #tpu.pipeline_mode<synchronous>, transform_indices = @transform_8, window_bounds = array<i64: 9, 1>}, {transform_indices = @transform_9, window_bounds = array<i64: 9, 128>}]} {
    %c0 = arith.constant 0 : index
    %c0_0 = arith.constant 0 : index
    %0 = vector.load %arg1[%c0, %c0_0] : memref<128x105xbf16, #tpu.memory_space<vmem>>, vector<128x105xbf16>
    %c0_1 = arith.constant 0 : index
    %c0_2 = arith.constant 0 : index
    %1 = vector.load %arg2[%c0_1, %c0_2] : memref<96x105xbf16, #tpu.memory_space<vmem>>, vector<96x105xbf16>
    %cst = arith.constant dense<0.000000e+00> : vector<96x128xf32>
    %2 = tpu.matmul %1, %0, %cst {dimension_numbers = #tpu.dot_dimension_numbers<[1], [1], [0], [0], [0, 0, 1, 0], [], []>} : vector<96x105xbf16>, vector<128x105xbf16>, vector<96x128xf32> -> vector<96x128xf32>
    %c0_3 = arith.constant 0 : index
    %c0_4 = arith.constant 0 : index
    %3 = vector.load %arg3[%c0_3, %c0_4] : memref<96x1xf32, #tpu.memory_space<vmem>>, vector<96x1xf32>
    %4 = vector.broadcast %3 : vector<96x1xf32> to vector<96x128xf32>
    %5 = arith.addf %2, %4 : vector<96x128xf32>
    %cst_5 = arith.constant 0.000000e+00 : f32
    %6 = vector.broadcast %cst_5 : f32 to vector<96x128xf32>
    %7 = arith.maximumf %5, %6 : vector<96x128xf32>
    %8 = arith.truncf %7 : vector<96x128xf32> to vector<96x128xbf16>
    %c0_6 = arith.constant 0 : index
    %c0_7 = arith.constant 0 : index
    %9 = vector.load %arg4[%c0_6, %c0_7] : memref<48x96xbf16, #tpu.memory_space<vmem>>, vector<48x96xbf16>
    %cst_8 = arith.constant dense<0.000000e+00> : vector<48x128xf32>
    %10 = tpu.matmul %9, %8, %cst_8 {dimension_numbers = #tpu.dot_dimension_numbers<[1], [0], [0], [1], [0, 0, 1, 1], [], []>} : vector<48x96xbf16>, vector<96x128xbf16>, vector<48x128xf32> -> vector<48x128xf32>
    %c0_9 = arith.constant 0 : index
    %c0_10 = arith.constant 0 : index
    %11 = vector.load %arg5[%c0_9, %c0_10] : memref<48x1xf32, #tpu.memory_space<vmem>>, vector<48x1xf32>
    %12 = vector.broadcast %11 : vector<48x1xf32> to vector<48x128xf32>
    %13 = arith.addf %10, %12 : vector<48x128xf32>
    %cst_11 = arith.constant 0.000000e+00 : f32
    %14 = vector.broadcast %cst_11 : f32 to vector<48x128xf32>
    %15 = arith.maximumf %13, %14 : vector<48x128xf32>
    %16 = arith.truncf %15 : vector<48x128xf32> to vector<48x128xbf16>
    %c0_12 = arith.constant 0 : index
    %c0_13 = arith.constant 0 : index
    %17 = vector.load %arg6[%c0_12, %c0_13] : memref<24x48xbf16, #tpu.memory_space<vmem>>, vector<24x48xbf16>
    %cst_14 = arith.constant dense<0.000000e+00> : vector<24x128xf32>
    %18 = tpu.matmul %17, %16, %cst_14 {dimension_numbers = #tpu.dot_dimension_numbers<[1], [0], [0], [1], [0, 0, 1, 1], [], []>} : vector<24x48xbf16>, vector<48x128xbf16>, vector<24x128xf32> -> vector<24x128xf32>
    %c0_15 = arith.constant 0 : index
    %c0_16 = arith.constant 0 : index
    %19 = vector.load %arg7[%c0_15, %c0_16] : memref<24x1xf32, #tpu.memory_space<vmem>>, vector<24x1xf32>
    %20 = vector.broadcast %19 : vector<24x1xf32> to vector<24x128xf32>
    %21 = arith.addf %18, %20 : vector<24x128xf32>
    %cst_17 = arith.constant 0.000000e+00 : f32
    %22 = vector.broadcast %cst_17 : f32 to vector<24x128xf32>
    %23 = arith.maximumf %21, %22 : vector<24x128xf32>
    %24 = arith.truncf %23 : vector<24x128xf32> to vector<24x128xbf16>
    %c0_18 = arith.constant 0 : index
    %c0_19 = arith.constant 0 : index
    %25 = vector.load %arg8[%c0_18, %c0_19] : memref<9x24xbf16, #tpu.memory_space<vmem>>, vector<9x24xbf16>
    %cst_20 = arith.constant dense<0.000000e+00> : vector<9x128xf32>
    %26 = tpu.matmul %25, %24, %cst_20 {dimension_numbers = #tpu.dot_dimension_numbers<[1], [0], [0], [1], [0, 0, 1, 1], [], []>} : vector<9x24xbf16>, vector<24x128xbf16>, vector<9x128xf32> -> vector<9x128xf32>
    %c0_21 = arith.constant 0 : index
    %c0_22 = arith.constant 0 : index
    %27 = vector.load %arg9[%c0_21, %c0_22] : memref<9x1xf32, #tpu.memory_space<vmem>>, vector<9x1xf32>
    %28 = vector.broadcast %27 : vector<9x1xf32> to vector<9x128xf32>
    %29 = arith.addf %26, %28 : vector<9x128xf32>
    %30 = math.tanh %29 : vector<9x128xf32>
    %c0_23 = arith.constant 0 : index
    %c0_24 = arith.constant 0 : index
    %31 = vector.load %arg10[%c0_23, %c0_24] : memref<9x128xf32, #tpu.memory_space<vmem>>, vector<9x128xf32>
    tpu.vector_store %arg10[%c0_23, %c0_24], %30 {strides = array<i32>} : memref<9x128xf32, #tpu.memory_space<vmem>>, vector<9x128xf32>,
    return
  }
  func.func @transform_0(%arg0: i32) -> (i32, i32) {
    %c0_i32 = arith.constant 0 : i32
    %c0_i32_0 = arith.constant 0 : i32
    return %arg0, %c0_i32 : i32, i32
  }
  func.func @transform_1(%arg0: i32) -> (i32, i32) {
    %c0_i32 = arith.constant 0 : i32
    %c0_i32_0 = arith.constant 0 : i32
    %c0_i32_1 = arith.constant 0 : i32
    return %c0_i32, %c0_i32_0 : i32, i32
  }
  func.func @transform_2(%arg0: i32) -> (i32, i32) {
    %c0_i32 = arith.constant 0 : i32
    %c0_i32_0 = arith.constant 0 : i32
    %c0_i32_1 = arith.constant 0 : i32
    return %c0_i32, %c0_i32_0 : i32, i32
  }
  func.func @transform_3(%arg0: i32) -> (i32, i32) {
    %c0_i32 = arith.constant 0 : i32
    %c0_i32_0 = arith.constant 0 : i32
    %c0_i32_1 = arith.constant 0 : i32
    return %c0_i32, %c0_i32_0 : i32, i32
  }
  func.func @transform_4(%arg0: i32) -> (i32, i32) {
    %c0_i32 = arith.constant 0 : i32
    %c0_i32_0 = arith.constant 0 : i32
    %c0_i32_1 = arith.constant 0 : i32
    return %c0_i32, %c0_i32_0 : i32, i32
  }
  func.func @transform_5(%arg0: i32) -> (i32, i32) {
    %c0_i32 = arith.constant 0 : i32
    %c0_i32_0 = arith.constant 0 : i32
    %c0_i32_1 = arith.constant 0 : i32
    return %c0_i32, %c0_i32_0 : i32, i32
  }
  func.func @transform_6(%arg0: i32) -> (i32, i32) {
    %c0_i32 = arith.constant 0 : i32
    %c0_i32_0 = arith.constant 0 : i32
    %c0_i32_1 = arith.constant 0 : i32
    return %c0_i32, %c0_i32_0 : i32, i32
  }
  func.func @transform_7(%arg0: i32) -> (i32, i32) {
    %c0_i32 = arith.constant 0 : i32
    %c0_i32_0 = arith.constant 0 : i32
    %c0_i32_1 = arith.constant 0 : i32
    return %c0_i32, %c0_i32_0 : i32, i32
  }
  func.func @transform_8(%arg0: i32) -> (i32, i32) {
    %c0_i32 = arith.constant 0 : i32
    %c0_i32_0 = arith.constant 0 : i32
    %c0_i32_1 = arith.constant 0 : i32
    return %c0_i32, %c0_i32_0 : i32, i32
  }
  func.func @transform_9(%arg0: i32) -> (i32, i32) {
    %c0_i32 = arith.constant 0 : i32
    %c0_i32_0 = arith.constant 0 : i32
    return %c0_i32, %arg0 : i32, i32
  }
}

</mosaic_0001>

<bundles_post_ra>
// kernel: corr_net_forward.1
= control target key start
LH: loop header
LB: loop body
LE: loop exit
PB: predicated region body
PF: predicated region fallthrough
CT: control target
= control target key end

     0   :  { %s1142_s30 = smov 0   ;;  %s1144_s10 = smov 0   ;;  %s1324_s0 = inlined_call_operand.vmem [shape: bf16[256,105], index: 0, kind: input, shape index: {}]   ;;  %s1325_s1 = inlined_call_operand.vmem [shape: bf16[96,105], index: 1, kind: input, shape index: {}]   ;;  %s1326_s2 = inlined_call_operand.vmem [shape: f32[96,1], index: 2, kind: input, shape index: {}]   ;;  %s1327_s3 = inlined_call_operand.vmem [shape: bf16[48,96], index: 3, kind: input, shape index: {}]   ;;  %s1328_s4 = inlined_call_operand.vmem [shape: f32[48,1], index: 4, kind: input, shape index: {}]   ;;  %s1329_s5 = inlined_call_operand.vmem [shape: bf16[24,48], index: 5, kind: input, shape index: {}]   ;;  %s1330_s6 = inlined_call_operand.vmem [shape: f32[24,1], index: 6, kind: input, shape index: {}]   ;;  %s1331_s7 = inlined_call_operand.vmem [shape: bf16[9,24], index: 7, kind: input, shape index: {}]   ;;  %s1332_s8 = inlined_call_operand.vmem [shape: f32[9,1], index: 8, kind: input, shape index: {}]   ;;  %s1333_s9 = inlined_call_operand.vmem [shape: f32[9,256], index: 9, kind: output, shape index: {}]  }
   0x1   :  { %s1146_s11 = smov 0  }
   0x2 LB: > { %s1155_s12 = sadd.s32 4294967295, %s1089_s11   ;;  %s1157_s13 = sadd.s32 1, %s1089_s11   ;;  %s1089_s11 = sphi %s1146_s11, %s1337_s11   ;;  %s1085_s10 = sphi %s1144_s10, %s1336_s10   ;;  %s1081_s30 = sphi %s1142_s30, %s1335_s30  }
   0x3   : > { %s217_s14 = ssub.s32 %s1089_s11, %s1157_s13  ;;  %s220_s15 = sadd.s32 1, %s1085_s10 }
   0x4   : > { %p218_p0 = scmp.eq.s32.totalorder %s217_s14, 0  ;;  %p230_p1 = scmp.ne.s32.totalorder %s1085_s10, %s1081_s30 }
   0x5   : > { %p231_p2 = scmp.eq.s32.totalorder %s1155_s12, 1  ;;  %p904_p3 = scmp.ge.s32.totalorder %s1089_s11, 1 }
   0x6   : > { %s1165_s16 = scalar_select %p218_p0, %s1085_s10, %s220_s15  }
   0x7   : > { %p1167_p4 = por %p231_p2, %p230_p1  ;;  %p288_p5 = scmp.lt.s32.totalorder %s1089_s11, 3 }
   0x9   : > { %p289_p6 = pnand %p904_p3, %p288_p5 }
   0xa   : > { %s906_s18 = sshll.u32 (!%p289_p6), %s1155_s12, 4  ;;  %s320_s21 = sand.u32 (!%p289_p6), 1, %s1081_s30  }
   0xb   : > { %292 = sbr.rel (%p289_p6) target bundleno = 767 (0x2ff), region = 56  ;;  %p324_p7 = scmp.lt.s32.totalorder (!%p289_p6), %s906_s18, 31 }
   0xc   : > { %s905_s23 = sshll.u32 (!%p289_p6), %s320_s21, 4 }
   0xd   : > { %s322_s24 = scalar_lea.vmem (!%p289_p6), [#allocation2], %s905_s23 }
  0x10   : > { %s1339_s18 = smov (!%p324_p7, %s906_s18), 31  ;;  %vm500_vm0 = vcmask 859136   ;;  %v368_v3 = vld [vmem:[%s1326_s2 + $0x50] sm:$0xff]  ;;  %v1091_v4 = vmov 0   ;;  %v366_v7 = vld [vmem:[%s1326_s2 + $0x40] sm:$0xff]  ;;  %v369_v8 = vld [vmem:[%s1326_s2 + $0x58] sm:$0xff] }
  0x11   : > { %s907_s19 = sshll.u32 %s1339_s18, 2  ;;  %1060 = vset.pattern.permute.xlu0 %v1091_v4  ;;  %1061 = vset.pattern.permute.xlu1 %v1091_v4  ;;  %v367_v11 = vld [vmem:[%s1326_s2 + $0x48] sm:$0xff]  ;;  %v362_v12 = vld [vmem:[%s1326_s2 + $0x20] sm:$0xff]  ;;  %v361_v17 = vld [vmem:[%s1326_s2 + $0x18] sm:$0xff]  ;;  %vm657_vm1 = vcmask 785408   ;;  %vm729_vm2 = vcmask 392192  }
  0x12   : > { %s1175_s22 = scalar_lea.vmem %s1324_s0, %s907_s19  ;;  %422 = vperm.xlu0 %1060, %v368_v3   ;;  %1062 = vset.pattern.permute.xlu2 %v1091_v4  ;;  %v363_v15 = vld [vmem:[%s1326_s2 + $0x28] sm:$0xff]  ;;  %v358_v18 = vld [vmem:[%s1326_s2] sm:$0xff]  ;;  %v364_v20 = vld [vmem:[%s1326_s2 + $0x30] sm:$0xff]  ;;  %vm782_vm3 = vcmask 1043456   ;;  %vm778_vm4 = vcmask 195584   ;;  %s997_s25 = sshll.u32 (%p1167_p4), %s1155_s12, 3 }
  0x13   : > { %v1007_v0 = vld [vmem:[%s1175_s22 + $0x38] sm:$0xff]  ;;  %v1006_v2 = vld [vmem:[%s1175_s22 + $0x30] sm:$0xff]  ;;  %v1005_v6 = vld [vmem:[%s1175_s22 + $0x28] sm:$0xff]  ;;  %412 = vperm.xlu1 %1061, %v366_v7   ;;  %402 = vperm.xlu2 %1062, %v364_v20   ;;  %s812_s27 = scalar_lea.vmem (%p1167_p4), %s1333_s9, %s997_s25 }
  0x14   : > { %v541_v1 = vsel %vm500_vm0, %v1007_v0, 0  ;;  %v538_v5 = vsel %vm500_vm0, %v1006_v2, 0  ;;  %v535_v9 = vsel %vm500_vm0, %v1005_v6, 0  ;;  %v1004_v10 = vld [vmem:[%s1175_s22 + $0x20] sm:$0xff]  ;;  %v1003_v14 = vld [vmem:[%s1175_s22 + $0x18] sm:$0xff]  ;;  %v1002_v19 = vld [vmem:[%s1175_s22 + $0x10] sm:$0xff] }
  0x15   : > { %543 = vmatpush.bf16.xpose.msra.mxu0 %v541_v1  ;;  %1019 = vmatpush.bf16.xpose.msra.mxu2 %v541_v1  ;;  %v532_v13 = vsel %vm500_vm0, %v1004_v10, 0  ;;  %v529_v16 = vsel %vm500_vm0, %v1003_v14, 0  ;;  %v526_v21 = vsel %vm500_vm0, %v1002_v19, 0  ;;  %v610_v22 = vld [vmem:[%s1328_s4 + $0x20] sm:$0xff]  ;;  %v611_v23 = vld [vmem:[%s1328_s4 + $0x28] sm:$0xff]  ;;  %v609_v26 = vld [vmem:[%s1328_s4 + $0x18] sm:$0xff] }
  0x16   : > { %1020 = vmatpush.bf16.xpose.msra.mxu3 %v541_v1  ;;  %v1001_v24 = vld [vmem:[%s1175_s22 + $0x8] sm:$0xff]  ;;  %v365_v27 = vld [vmem:[%s1326_s2 + $0x38] sm:$0xff]  ;;  %v606_v28 = vld [vmem:[%s1328_s4] sm:$0xff] }
  0x17   : > { %v523_v25 = vsel %vm500_vm0, %v1001_v24, 0  ;;  %v1000_v29 = vld [vmem:[%s1175_s22] sm:$0xff]  ;;  %v705_v31 = vld [vmem:[%s1330_s6 + $0x10] sm:$0xff]  ;;  %v359_v38 = vld [vmem:[%s1326_s2 + $0x8] sm:$0xff] }
  0x18   : > { %v520_v30 = vsel %vm500_vm0, %v1000_v29, 0  ;;  %v360_v32 = vld [vmem:[%s1326_s2 + $0x10] sm:$0xff]  ;;  %v703_v33 = vld [vmem:[%s1330_s6] sm:$0xff]  ;;  %v762_v39 = vld [vmem:[%s1332_s8 + $0x8] sm:$0x1] }
  0x19   : > { %v1008_v34 = vld [vmem:[%s1325_s1] sm:$0xff]  ;;  %v1010_v35 = vld [vmem:[%s1325_s1 + $0x10] sm:$0xff]  ;;  %v1009_v41 = vld [vmem:[%s1325_s1 + $0x8] sm:$0xff] }
  0x1a   : > { %427 = vperm.xlu0 %1060, %v369_v8   ;;  %v1012_v36 = vld [vmem:[%s1325_s1 + $0x20] sm:$0xff]  ;;  %v608_v40 = vld [vmem:[%s1328_s4 + $0x10] sm:$0xff]  ;;  %v1011_v42 = vld [vmem:[%s1325_s1 + $0x18] sm:$0xff] }
  0x1b   : > { %417 = vperm.xlu1 %1061, %v367_v11   ;;  %407 = vperm.xlu2 %1062, %v365_v27   ;;  %v761_v37 = vld [vmem:[%s1332_s8] sm:$0xff]  ;;  %v1013_v43 = vld [vmem:[%s1325_s1 + $0x28] sm:$0xff] }
  0x1c   : > { %v607_v44 = vld [vmem:[%s1328_s4 + $0x8] sm:$0xff] }
  0x1d   : > { %544 = vmatpush.bf16.xpose.msra.mxu0 %v538_v5  ;;  %1021 = vmatpush.bf16.xpose.msra.mxu2 %v538_v5  ;;  %v704_v45 = vld [vmem:[%s1330_s6 + $0x8] sm:$0xff] }
  0x1e   : > { %1022 = vmatpush.bf16.xpose.msra.mxu3 %v538_v5 }
  0x22   : > { %392 = vperm.xlu0 %1060, %v362_v12  }
  0x23   : > { %397 = vperm.xlu1 %1061, %v363_v15   ;;  %382 = vperm.xlu2 %1062, %v360_v32  }
  0x25   : > { %545 = vmatpush.bf16.xpose.msra.mxu0 %v535_v9  ;;  %1023 = vmatpush.bf16.xpose.msra.mxu2 %v535_v9 }
  0x26   : > { %1024 = vmatpush.bf16.xpose.msra.mxu3 %v535_v9 }
  0x2a   : > { %387 = vperm.xlu0 %1060, %v361_v17  }
  0x2b   : > { %372 = vperm.xlu1 %1061, %v358_v18   ;;  %377 = vperm.xlu2 %1062, %v359_v38   ;;  %v1016_v38 = vld [vmem:[%s1327_s3 + $0x10] sm:$0xff] }
  0x2d   : > { %546 = vmatpush.bf16.xpose.msra.mxu0 %v532_v13  ;;  %1025 = vmatpush.bf16.xpose.msra.mxu2 %v532_v13 }
  0x2e   : > { %1026 = vmatpush.bf16.xpose.msra.mxu3 %v532_v13 }
  0x32   : > { %634 = vperm.xlu0 %1060, %v610_v22  }
  0x33   : > { %639 = vperm.xlu1 %1061, %v611_v23   ;;  %624 = vperm.xlu2 %1062, %v608_v40  }
  0x35   : > { %547 = vmatpush.bf16.xpose.msra.mxu0 %v529_v16  ;;  %1027 = vmatpush.bf16.xpose.msra.mxu2 %v529_v16 }
  0x36   : > { %1028 = vmatpush.bf16.xpose.msra.mxu3 %v529_v16 }
  0x3a   : > { %629 = vperm.xlu0 %1060, %v609_v26  }
  0x3b   : > { %614 = vperm.xlu1 %1061, %v606_v28   ;;  %619 = vperm.xlu2 %1062, %v607_v44  }
  0x3d   : > { %548 = vmatpush.bf16.xpose.msra.mxu0 %v526_v21  ;;  %1029 = vmatpush.bf16.xpose.msra.mxu2 %v526_v21 }
  0x3e   : > { %1030 = vmatpush.bf16.xpose.msra.mxu3 %v526_v21 }
  0x42   : > { %718 = vperm.xlu0 %1060, %v705_v31  }
  0x43   : > { %708 = vperm.xlu1 %1061, %v703_v33   ;;  %713 = vperm.xlu2 %1062, %v704_v45  }
  0x45   : > { %549 = vmatpush.bf16.xpose.msra.mxu0 %v523_v25  ;;  %1031 = vmatpush.bf16.xpose.msra.mxu2 %v523_v25 }
  0x46   : > { %1032 = vmatpush.bf16.xpose.msra.mxu3 %v523_v25 }
  0x4a   : > { %765 = vperm.xlu0 %1060, %v761_v37   ;;  %v1015_v37 = vld [vmem:[%s1327_s3 + $0x8] sm:$0xff] }
  0x4b   : > { %770 = vperm.xlu1 %1061, %v762_v39  }
  0x4d   : > { %550 = vmatpush.bf16.xpose.msra.mxu0 %v520_v30  ;;  %1033 = vmatpush.bf16.xpose.msra.mxu2 %v520_v30 }
  0x4e   : > { %1034 = vmatpush.bf16.xpose.msra.mxu3 %v520_v30 }
  0x54   : > { %964 = vmatmul.msk.bf16.vlgmr.msra.gmra.mxu0 %vm500_vm0, %v1008_v34  ;;  %966 = vmatmul.msk.bf16.vlgmr.msra.gmra.mxu2 %vm500_vm0, %v1010_v35 }
  0x55   : > { %968 = vmatmul.msk.bf16.vlgmr.msra.gmra.mxu3 %vm500_vm0, %v1012_v36  ;;  %v1014_v36 = vld [vmem:[%s1327_s3] sm:$0xff] }
  0x64   : > { %965 = vmatmul.msk.bf16.gmra.mxu0 %vm500_vm0, %v1009_v41  ;;  %967 = vmatmul.msk.bf16.gmra.mxu2 %vm500_vm0, %v1011_v42 }
  0x65   : > { %969 = vmatmul.msk.bf16.gmra.mxu3 %vm500_vm0, %v1013_v43 }
  0x6d   : > { %v403_v53 = vpop.permute.xlu2 %402 }
  0x75   : > { %v408_v59 = vpop.permute.xlu2 %407 }
  0x7d   : > { %v383_v10 = vpop.permute.xlu2 %382 }
  0x84   : > { %v423_v49 = vpop.permute.xlu0 %422 }
  0x85   : > { %v413_v52 = vpop.permute.xlu1 %412  ;;  %v378_v27 = vpop.permute.xlu2 %377 }
  0x8c   : > { %v428_v55 = vpop.permute.xlu0 %427 }
  0x8d   : > { %v418_v58 = vpop.permute.xlu1 %417  ;;  %v625_v45 = vpop.permute.xlu2 %624 }
  0x94   : > { %v393_v1 = vpop.permute.xlu0 %392 }
  0x95   : > { %v398_v6 = vpop.permute.xlu1 %397 }
  0x9c   : > { %v388_v19 = vpop.permute.xlu0 %387 }
  0x9d   : > { %v373_v25 = vpop.permute.xlu1 %372 }
  0xa4   : > { %v635_v43 = vpop.permute.xlu0 %634 }
  0xd1   : > { %v552_v48 = vpop.f32.mrf.mxu0 }
  0xd2   : > { %v553_v26 = vadd.f32 %v552_v48, %v373_v25  ;;  %v630_v48 = vpop.permute.xlu0 %629 }
  0xd4   : > { %v582_v32 = vmax.f32 %v553_v26, 0.0 }
  0xd7   : > { %v562_v46 = vpop.f32.mrf.mxu2 }
  0xd8   : > { %v572_v47 = vpop.f32.mrf.mxu3  ;;  %v563_v13 = vadd.f32 %v562_v46, %v393_v1  ;;  %v640_v46 = vpop.permute.xlu1 %639 }
  0xd9   : > { %v554_v54 = vpop.f32.mrf.mxu0  ;;  %v573_v3 = vadd.f32 %v572_v47, %v413_v52 }
  0xda   : > { %v586_v20 = vmax.f32 %v563_v13, 0.0  ;;  %v555_v28 = vadd.f32 %v554_v54, %v378_v27 }
  0xdb   : > { %v590_v11 = vmax.f32 %v573_v3, 0.0  ;;  %v702_v3 = vld [vmem:[%s1329_s5 + $0x8] sm:$0xf] }
  0xdc   : > { %v583_v33 = vmax.f32 %v555_v28, 0.0 }
  0xde   : > { %v594_v35 = vpack.c.bf16 %v583_v33, %v582_v32 }
  0xdf   : > { %v564_v50 = vpop.f32.mrf.mxu2 }
  0xe0   : > { %v574_v51 = vpop.f32.mrf.mxu3  ;;  %v565_v14 = vadd.f32 %v564_v50, %v398_v6 }
  0xe1   : > { %v557_v61 = vpop.f32.mrf.mxu0  ;;  %v575_v63 = vadd.f32 %v574_v51, %v418_v58 }
  0xe2   : > { %v587_v21 = vmax.f32 %v565_v14, 0.0  ;;  %v558_v22 = vadd.f32 %v557_v61, %v383_v10 }
  0xe3   : > { %v591_v7 = vmax.f32 %v575_v63, 0.0 }
  0xe4   : > { %v584_v29 = vmax.f32 %v558_v22, 0.0  ;;  %v596_v31 = vpack.c.bf16 %v587_v21, %v586_v20  ;;  %v993_v21 = vld [vmem:[%s1331_s7] sm:$0xf]  ;;  %v1018_v22 = vld [vmem:[%s1331_s7] sm:$0x10] }
  0xe5   : > { %v598_v16 = vpack.c.bf16 %v591_v7, %v590_v11 }
  0xe7   : > { %v567_v56 = vpop.f32.mrf.mxu2 }
  0xe8   : > { %v577_v57 = vpop.f32.mrf.mxu3  ;;  %v568_v12 = vadd.f32 %v567_v56, %v403_v53 }
  0xe9   : > { %v578_v60 = vadd.f32 %v577_v57, %v423_v49  ;;  %v559_v17 = vpop.f32.mrf.mxu0 }
  0xea   : > { %v588_v18 = vmax.f32 %v568_v12, 0.0  ;;  %v560_v23 = vadd.f32 %v559_v17, %v388_v19 }
  0xeb   : > { %v592_v4 = vmax.f32 %v578_v60, 0.0 }
  0xec   : > { %v585_v30 = vmax.f32 %v560_v23, 0.0 }
  0xee   : > { %v595_v34 = vpack.c.bf16 %v585_v30, %v584_v29 }
  0xef   : > { %v569_v2 = vpop.f32.mrf.mxu2 }
  0xf0   : > { %v579_v62 = vpop.f32.mrf.mxu3  ;;  %v570_v8 = vadd.f32 %v569_v2, %v408_v59  ;;  %v615_v59 = vpop.permute.xlu1 %614  ;;  %v1017_v2 = vld [vmem:[%s1329_s5] sm:$0xff] }
  0xf1   : > { %v580_v0 = vadd.f32 %v579_v62, %v428_v55  ;;  %v620_v55 = vpop.permute.xlu2 %619 }
  0xf2   : > { %v589_v15 = vmax.f32 %v570_v8, 0.0  ;;  %v719_v8 = vpop.permute.xlu0 %718 }
  0xf3   : > { %v593_v5 = vmax.f32 %v580_v0, 0.0 }
  0xf4   : > { %v597_v24 = vpack.c.bf16 %v589_v15, %v588_v18 }
  0xf5   : > { %v599_v9 = vpack.c.bf16 %v593_v5, %v592_v4  ;;  %v726_v4 = vunpack.c.l.b16 %v702_v3 }
  0xf7   : > { %669 = vmatpush.bf16.msra.mxu1 %v599_v9  ;;  %v728_v5 = vpack.c.b16 %v726_v4, %v726_v4 }
  0xf8   : > { %v709_v13 = vpop.permute.xlu1 %708 }
  0xf9   : > { %v714_v10 = vpop.permute.xlu2 %713 }
  0xfa   : > { %v766_v25 = vpop.permute.xlu0 %765 }
  0xfb   : > { %670 = vmatpush.bf16.msra.mxu1 %v598_v16 }
  0xff   : > { %671 = vmatpush.bf16.msra.mxu1 %v597_v24  ;;  %v994_v24 = vor.u32 %v1018_v22, %v993_v21 }
 0x100   : > { %v771_v28 = vpop.permute.xlu1 %770 }
 0x103   : > { %672 = vmatpush.bf16.msra.mxu1 %v596_v31 }
 0x107   : > { %673 = vmatpush.bf16.msra.mxu1 %v595_v34 }
 0x10b   : > { %674 = vmatpush.bf16.msra.mxu1 %v594_v35 }
 0x10e   : > { %982 = vmatmul.msk.bf16.vlgmr.msra.gmra.mxu1 %vm657_vm1, %v1014_v36 }
 0x11e   : > { %983 = vmatmul.msk.bf16.gmra.mxu1 %vm657_vm1, %v1015_v37 }
 0x12e   : > { %984 = vmatmul.msk.bf16.gmra.mxu1 %vm657_vm1, %v1016_v38 }
 0x18b   : > { %v676_v39 = vpop.f32.mrf.mxu1 }
 0x18c   : > { %v677_v60 = vadd.f32 %v676_v39, %v615_v59 }
 0x18e   : > { %v691_v0 = vmax.f32 %v677_v60, 0.0 }
 0x193   : > { %v678_v40 = vpop.f32.mrf.mxu1 }
 0x194   : > { %v679_v56 = vadd.f32 %v678_v40, %v620_v55 }
 0x196   : > { %v692_v62 = vmax.f32 %v679_v56, 0.0 }
 0x198   : > { %v697_v1 = vpack.c.bf16 %v692_v62, %v691_v0 }
 0x19b   : > { %v681_v41 = vpop.f32.mrf.mxu1 }
 0x19c   : > { %v682_v52 = vadd.f32 %v681_v41, %v625_v45 }
 0x19e   : > { %v693_v61 = vmax.f32 %v682_v52, 0.0 }
 0x1a3   : > { %v683_v42 = vpop.f32.mrf.mxu1 }
 0x1a4   : > { %v684_v50 = vadd.f32 %v683_v42, %v630_v48 }
 0x1a6   : > { %v694_v57 = vmax.f32 %v684_v50, 0.0 }
 0x1a8   : > { %v698_v63 = vpack.c.bf16 %v694_v57, %v693_v61 }
 0x1ab   : > { %v686_v44 = vpop.f32.mrf.mxu1 }
 0x1ac   : > { %v687_v47 = vadd.f32 %v686_v44, %v635_v43 }
 0x1ae   : > { %v695_v53 = vmax.f32 %v687_v47, 0.0 }
 0x1b3   : > { %v688_v49 = vpop.f32.mrf.mxu1 }
 0x1b4   : > { %v689_v51 = vadd.f32 %v688_v49, %v640_v46 }
 0x1b6   : > { %v696_v54 = vmax.f32 %v689_v51, 0.0 }
 0x1b8   : > { %v699_v58 = vpack.c.bf16 %v696_v54, %v695_v53 }
 0x1ba   : > { %741 = vmatpush.bf16.msrb.mxu1 %v699_v58 }
 0x1be   : > { %742 = vmatpush.bf16.msrb.mxu1 %v698_v63 }
 0x1c2   : > { %743 = vmatpush.bf16.msrb.mxu1 %v697_v1 }
 0x1c5   : > { %989 = vmatmul.msk.bf16.vlgmr.msrb.gmra.mxu1 %vm729_vm2, %v1017_v2 }
 0x1d5   : > { %990 = vmatmul.msk.bf16.gmra.mxu1 %vm729_vm2, %v728_v5 }
 0x242   : > { %v745_v6 = vpop.f32.mrf.mxu1 }
 0x243   : > { %v746_v15 = vadd.f32 %v745_v6, %v709_v13 }
 0x245   : > { %v754_v19 = vmax.f32 %v746_v15, 0.0 }
 0x24a   : > { %v747_v7 = vpop.f32.mrf.mxu1 }
 0x24b   : > { %v748_v12 = vadd.f32 %v747_v7, %v714_v10 }
 0x24d   : > { %v755_v17 = vmax.f32 %v748_v12, 0.0 }
 0x24f   : > { %v757_v23 = vpack.c.bf16 %v755_v17, %v754_v19 }
 0x252   : > { %v750_v9 = vpop.f32.mrf.mxu1 }
 0x253   : > { %v751_v11 = vadd.f32 %v750_v9, %v719_v8 }
 0x255   : > { %v756_v14 = vmax.f32 %v751_v11, 0.0 }
 0x257   : > { %v758_v16 = vpack.c.bf16 %v756_v14, %v756_v14 }
 0x259   : > { %v784_v18 = vsel %vm782_vm3, %v758_v16, 0 }
 0x25a   : > { %792 = vmatpush.bf16.msrb.mxu3 %v784_v18  ;;  %v752_v20 = vpop.f32.mrf.mxu1 }
 0x25e   : > { %793 = vmatpush.bf16.msrb.mxu3 %v757_v23 }
 0x261   : > { %995 = vmatmul.msk.bf16.vlgmr.msrb.gmra.mxu3 %vm778_vm4, %v994_v24 }
 0x2e4   : > { %v795_v26 = vpop.f32.mrf.mxu3 }
 0x2e5   : > { %v796_v27 = vadd.f32 %v795_v26, %v766_v25 }
 0x2e7   : > { %1063 = vtanh.f32 %v796_v27 }
 0x2ec   : > { %v797_v29 = vpop.f32.mrf.mxu3 }
 0x2ed   : > { %v1064_v30 = vpop.eup %1063  ;;  %v798_v31 = vadd.f32 %v797_v29, %v771_v28 }
 0x2ee   : > { %802 = vst [vmem:[%s322_s24] sm:$0xff] %v1064_v30 }
 0x2ef   : > { %1065 = vtanh.f32 %v798_v31 }
 0x2f2   : > { %810 = sbr.rel (!%p1167_p4) target bundleno = 767 (0x2ff), region = 60 }
 0x2f5   : > { %v1066_v32 = vpop.eup %1065  ;;  %v843_v33 = vld [vmem:[%s322_s24] sm:$0xff] (%p1167_p4) }
 0x2f6   : > { %803 = vst [vmem:[%s322_s24 + $0x8] sm:$0x1] %v1066_v32 }
 0x2f7   : > { %844 = vst [vmem:[%s812_s27] sm:$0xff] %v843_v33 }
 0x2fd   : > { %v845_v34 = vld [vmem:[%s322_s24 + $0x8] sm:$0xff] }
 0x2fe   : > { %846 = vst [vmem:[%s812_s27 + $0x10] sm:$0xff] %v845_v34 }
 0x2ff PF: > { %p16_p8 = scmp.ge.s32.totalorder %s1157_s13, 4   ;;  %s1335_s30 = smov %s1085_s10 }
 0x300   : > { %s1336_s10 = smov %s1165_s16  ;;  %s1337_s11 = smov %s1157_s13 }
 0x301   :  { %18 = sbr.rel (!%p16_p8) target bundleno = 2 (0x2), region = 124 }

</bundles_post_ra>
